<compile_context>
chip_gen: v7x
topology: tpu7x:2x2x1
jax: 0.10.0
libtpu: 0.0.40
codegen_flags: <defaults>
</compile_context>

<pallas_src>
import math

import jax
import jax.numpy as jnp
from jax.experimental import pallas as pl
from jax.experimental.pallas import tpu as pltpu


def _round_up(x, m):
    return ((x + m - 1) // m) * m


def _time_embedding_kernel(t_ref, f_ref, w1s_ref, w1c_ref, b1_ref, w2_ref, b2_ref, o_ref):
    # t_ref:   [TB, 1]        time steps (f32)
    # f_ref:   [1, half_p]    frequencies (f32, zero-padded)
    # w1s_ref: [half_p, Dp]   first Linear weight rows that multiply sin (bf16)
    # w1c_ref: [half_p, Dp]   first Linear weight rows that multiply cos (bf16)
    # b1_ref:  [1, Dp]        (f32)
    # w2_ref:  [Dp, Dp]       second Linear weight, [in, out] layout (bf16)
    # b2_ref:  [1, Dp]        (f32)
    # o_ref:   [TB, Dp]       output (f32)
    t = t_ref[...]                     # [TB, 1]
    freqs = f_ref[...]                 # [1, half_p]

    # time_steps.unsqueeze(1) @ embedding  (outer product via broadcast)
    args = t * freqs                   # [TB, half_p]

    # Split first matmul instead of concatenating [sin, cos] along the lane axis.
    h = jnp.dot(jnp.sin(args), w1s_ref[...], preferred_element_type=jnp.float32)
    h = h + jnp.dot(jnp.cos(args), w1c_ref[...], preferred_element_type=jnp.float32)
    h = h + b1_ref[...]

    # SiLU: h * sigmoid(h), keeping exp and the reciprocal on the EUP slot.
    h = h * pl.reciprocal(1.0 + jnp.exp(-h), approx=True)

    out = jnp.dot(h, w2_ref[...], preferred_element_type=jnp.float32) + b2_ref[...]
    o_ref[...] = out.astype(o_ref.dtype)


def time_embedding_forward(time_steps, embedding, w1, b1, w2, b2, *, block_b=256):
    """time_steps: [B] float/int array. w1/w2 stored as [in, out]. Returns [B, D] f32."""
    B = time_steps.shape[0]
    D = w1.shape[0]
    half = embedding.shape[-1]

    # Lane-dense padding of the feature dims.
    Dp = _round_up(D, 128)
    half_p = _round_up(half, 128)

    # Batch tile: multiple of 8 sublanes; 256 is a good default for v6e/v7x
    # (use ~128 on v5e). Tiny batches collapse to a single grid step.
    TB = _round_up(min(block_b, _round_up(B, 8)), 8)
    Bp = _round_up(B, TB)
    grid = (pl.cdiv(Bp, TB),)

    # --- pad & repack parameters (zero padding is numerically inert: padded
    #     frequency lanes hit zero weight rows, padded output columns get zero
    #     bias and zero w2 rows). ---
    t2d = jnp.zeros((Bp, 1), jnp.float32).at[:B, 0].set(time_steps.astype(jnp.float32))
    f2d = jnp.zeros((1, half_p), jnp.float32).at[0, :half].set(
        embedding.reshape(-1).astype(jnp.float32))

    w1 = w1.astype(jnp.float32)
    w2 = w2.astype(jnp.float32)
    w1s = jnp.zeros((half_p, Dp), jnp.float32).at[:half, :D].set(w1[:half, :])
    w1c = jnp.zeros((half_p, Dp), jnp.float32).at[:half, :D].set(w1[half:, :])
    w2p = jnp.zeros((Dp, Dp), jnp.float32).at[:D, :D].set(w2)
    b1p = jnp.zeros((1, Dp), jnp.float32).at[0, :D].set(b1.astype(jnp.float32))
    b2p = jnp.zeros((1, Dp), jnp.float32).at[0, :D].set(b2.astype(jnp.float32))

    # bf16 weights: halves HBM->VMEM weight traffic (kernel is weight-BW bound);
    # accumulation stays f32 inside the kernel.
    w1s = w1s.astype(jnp.bfloat16)
    w1c = w1c.astype(jnp.bfloat16)
    w2p = w2p.astype(jnp.bfloat16)

    # Generous-but-bounded VMEM budget: resident weights (+pipelining headroom)
    # plus a handful of (TB, Dp)/(TB, half_p) f32 tiles.
    weight_bytes = (2 * half_p * Dp + Dp * Dp) * 2 + 2 * Dp * 4 + half_p * 4
    tile_bytes = TB * (3 * Dp + 3 * half_p + 2) * 4
    vmem_limit = int(min(100 * 1024 * 1024,
                         max(32 * 1024 * 1024, 3 * weight_bytes + 4 * tile_bytes)))

    out = pl.pallas_call(
        _time_embedding_kernel,
        out_shape=jax.ShapeDtypeStruct((Bp, Dp), jnp.float32),
        grid=grid,
        in_specs=[
            pl.BlockSpec((TB, 1), lambda i: (i, 0)),        # time steps: tiled over B
            pl.BlockSpec((1, half_p), lambda i: (0, 0)),    # frequencies: resident
            pl.BlockSpec((half_p, Dp), lambda i: (0, 0)),   # W1 (sin rows): resident
            pl.BlockSpec((half_p, Dp), lambda i: (0, 0)),   # W1 (cos rows): resident
            pl.BlockSpec((1, Dp), lambda i: (0, 0)),        # b1: resident
            pl.BlockSpec((Dp, Dp), lambda i: (0, 0)),       # W2: resident
            pl.BlockSpec((1, Dp), lambda i: (0, 0)),        # b2: resident
        ],
        out_specs=pl.BlockSpec((TB, Dp), lambda i: (i, 0)),
        compiler_params=pltpu.CompilerParams(
            dimension_semantics=("parallel",),
            vmem_limit_bytes=vmem_limit,
        ),
    )(t2d, f2d, w1s, w1c, b1p, w2p, b2p)

    return out[:B, :D]


def make_params(time_embed_dim, max_period=10000.0, seed=0):
    """Deterministic synthetic parameters matching the PyTorch module's shapes."""
    half = time_embed_dim // 2
    denom = max(half - 1, 1)
    embedding = jnp.exp(
        jnp.arange(half, dtype=jnp.float32) * -(math.log(max_period) / denom)
    )
    key = jax.random.PRNGKey(seed)
    k1, k2, k3, k4 = jax.random.split(key, 4)
    scale = 1.0 / math.sqrt(time_embed_dim)
    # Stored as [in, out] (transpose of PyTorch's [out, in]) so kernels compute x @ W + b.
    w1 = jax.random.uniform(k1, (time_embed_dim, time_embed_dim), jnp.float32, -scale, scale)
    b1 = jax.random.uniform(k2, (time_embed_dim,), jnp.float32, -scale, scale)
    w2 = jax.random.uniform(k3, (time_embed_dim, time_embed_dim), jnp.float32, -scale, scale)
    b2 = jax.random.uniform(k4, (time_embed_dim,), jnp.float32, -scale, scale)
    return embedding, w1, b1, w2, b2


def reference_forward(time_steps, embedding, w1, b1, w2, b2):
    """Pure-JAX reference mirroring the PyTorch forward (x @ W + b convention)."""
    t = time_steps.astype(jnp.float32)[:, None]             # [B, 1]
    args = t @ embedding[None, :]                            # [B, half]
    emb = jnp.concatenate([jnp.sin(args), jnp.cos(args)], axis=1)
    h = emb @ w1 + b1
    h = h * jax.nn.sigmoid(h)
    return h @ w2 + b2


if __name__ == "__main__":
    time_embed_dim = 32
    batch = 8

    embedding, w1, b1, w2, b2 = make_params(time_embed_dim, seed=0)

    key = jax.random.PRNGKey(0)
    time_steps = jax.random.randint(key, (batch,), 0, 1000).astype(jnp.float32)

    out = time_embedding_forward(time_steps, embedding, w1, b1, w2, b2)
    out = jax.block_until_ready(out)

    # Compare against a reference that sees the same bf16-quantized weights, so
    # the only differences are accumulation order and the approx reciprocal.
    w1_q = w1.astype(jnp.bfloat16).astype(jnp.float32)
    w2_q = w2.astype(jnp.bfloat16).astype(jnp.float32)
    ref = reference_forward(time_steps, embedding, w1_q, b1, w2_q, b2)

    assert out.shape == (batch, time_embed_dim)
    assert jnp.allclose(out, ref, atol=2e-2, rtol=2e-2), "mismatch vs reference"

    print("KERNEL_OK")
</pallas_src>

<mosaic_0001>
module attributes {stable_mosaic.version = 11 : i64} {
  func.func @_time_embedding_kernel(%arg0: i32, %arg1: memref<8x1xf32, #tpu.memory_space<vmem>>, %arg2: memref<1x128xf32, #tpu.memory_space<vmem>>, %arg3: memref<128x128xbf16, #tpu.memory_space<vmem>>, %arg4: memref<128x128xbf16, #tpu.memory_space<vmem>>, %arg5: memref<1x128xf32, #tpu.memory_space<vmem>>, %arg6: memref<128x128xbf16, #tpu.memory_space<vmem>>, %arg7: memref<1x128xf32, #tpu.memory_space<vmem>>, %arg8: memref<8x128xf32, #tpu.memory_space<vmem>>) attributes {dimension_semantics = [#tpu.dimension_semantics<parallel>], iteration_bounds = array<i64: 1>, scalar_prefetch = 0 : i64, scratch_operands = 0 : i64, tpu.core_type = #tpu.core_type<tc>, window_params = [{transform_indices = @transform_0, window_bounds = array<i64: 8, 1>}, {pipeline_mode = #tpu.pipeline_mode<synchronous>, transform_indices = @transform_1, window_bounds = array<i64: 1, 128>}, {pipeline_mode = #tpu.pipeline_mode<synchronous>, transform_indices = @transform_2, window_bounds = array<i64: 128, 128>}, {pipeline_mode = #tpu.pipeline_mode<synchronous>, transform_indices = @transform_3, window_bounds = array<i64: 128, 128>}, {pipeline_mode = #tpu.pipeline_mode<synchronous>, transform_indices = @transform_4, window_bounds = array<i64: 1, 128>}, {pipeline_mode = #tpu.pipeline_mode<synchronous>, transform_indices = @transform_5, window_bounds = array<i64: 128, 128>}, {pipeline_mode = #tpu.pipeline_mode<synchronous>, transform_indices = @transform_6, window_bounds = array<i64: 1, 128>}, {transform_indices = @transform_7, window_bounds = array<i64: 8, 128>}]} {
    %c0 = arith.constant 0 : index
    %c0_0 = arith.constant 0 : index
    %0 = vector.load %arg1[%c0, %c0_0] : memref<8x1xf32, #tpu.memory_space<vmem>>, vector<8x1xf32>
    %c0_1 = arith.constant 0 : index
    %c0_2 = arith.constant 0 : index
    %1 = vector.load %arg2[%c0_1, %c0_2] : memref<1x128xf32, #tpu.memory_space<vmem>>, vector<1x128xf32>
    %2 = vector.broadcast %0 : vector<8x1xf32> to vector<8x128xf32>
    %3 = vector.broadcast %1 : vector<1x128xf32> to vector<8x128xf32>
    %4 = arith.mulf %2, %3 : vector<8x128xf32>
    %5 = math.sin %4 : vector<8x128xf32>
    %c0_3 = arith.constant 0 : index
    %c0_4 = arith.constant 0 : index
    %6 = vector.load %arg3[%c0_3, %c0_4] : memref<128x128xbf16, #tpu.memory_space<vmem>>, vector<128x128xbf16>
    %cst = arith.constant dense<0.000000e+00> : vector<8x128xf32>
    %7 = tpu.matmul %5, %6, %cst {dimension_numbers = #tpu.dot_dimension_numbers<[1], [0], [0], [1], [0, 0, 1, 1], [], []>} : vector<8x128xf32>, vector<128x128xbf16>, vector<8x128xf32> -> vector<8x128xf32>
    %8 = math.cos %4 : vector<8x128xf32>
    %c0_5 = arith.constant 0 : index
    %c0_6 = arith.constant 0 : index
    %9 = vector.load %arg4[%c0_5, %c0_6] : memref<128x128xbf16, #tpu.memory_space<vmem>>, vector<128x128xbf16>
    %cst_7 = arith.constant dense<0.000000e+00> : vector<8x128xf32>
    %10 = tpu.matmul %8, %9, %cst_7 {dimension_numbers = #tpu.dot_dimension_numbers<[1], [0], [0], [1], [0, 0, 1, 1], [], []>} : vector<8x128xf32>, vector<128x128xbf16>, vector<8x128xf32> -> vector<8x128xf32>
    %11 = arith.addf %7, %10 : vector<8x128xf32>
    %c0_8 = arith.constant 0 : index
    %c0_9 = arith.constant 0 : index
    %12 = vector.load %arg5[%c0_8, %c0_9] : memref<1x128xf32, #tpu.memory_space<vmem>>, vector<1x128xf32>
    %13 = vector.broadcast %12 : vector<1x128xf32> to vector<8x128xf32>
    %14 = arith.addf %11, %13 : vector<8x128xf32>
    %cst_10 = arith.constant 0.000000e+00 : f32
    %15 = vector.broadcast %cst_10 : f32 to vector<8x128xf32>
    %16 = arith.subf %15, %14 : vector<8x128xf32>
    %17 = math.exp %16 : vector<8x128xf32>
    %cst_11 = arith.constant 1.000000e+00 : f32
    %18 = vector.broadcast %cst_11 : f32 to vector<8x128xf32>
    %19 = arith.addf %18, %17 : vector<8x128xf32>
    %20 = tpu.reciprocal %19 {approx = true} : vector<8x128xf32> -> vector<8x128xf32>
    %21 = arith.mulf %14, %20 : vector<8x128xf32>
    %c0_12 = arith.constant 0 : index
    %c0_13 = arith.constant 0 : index
    %22 = vector.load %arg6[%c0_12, %c0_13] : memref<128x128xbf16, #tpu.memory_space<vmem>>, vector<128x128xbf16>
    %cst_14 = arith.constant dense<0.000000e+00> : vector<8x128xf32>
    %23 = tpu.matmul %21, %22, %cst_14 {dimension_numbers = #tpu.dot_dimension_numbers<[1], [0], [0], [1], [0, 0, 1, 1], [], []>} : vector<8x128xf32>, vector<128x128xbf16>, vector<8x128xf32> -> vector<8x128xf32>
    %c0_15 = arith.constant 0 : index
    %c0_16 = arith.constant 0 : index
    %24 = vector.load %arg7[%c0_15, %c0_16] : memref<1x128xf32, #tpu.memory_space<vmem>>, vector<1x128xf32>
    %25 = vector.broadcast %24 : vector<1x128xf32> to vector<8x128xf32>
    %26 = arith.addf %23, %25 : vector<8x128xf32>
    %c0_17 = arith.constant 0 : index
    %c0_18 = arith.constant 0 : index
    %27 = vector.load %arg8[%c0_17, %c0_18] : memref<8x128xf32, #tpu.memory_space<vmem>>, vector<8x128xf32>
    tpu.vector_store %arg8[%c0_17, %c0_18], %26 {strides = array<i32>} : memref<8x128xf32, #tpu.memory_space<vmem>>, vector<8x128xf32>,
    return
  }
  func.func @transform_0(%arg0: i32) -> (i32, i32) {
    %c0_i32 = arith.constant 0 : i32
    %c0_i32_0 = arith.constant 0 : i32
    return %arg0, %c0_i32 : i32, i32
  }
  func.func @transform_1(%arg0: i32) -> (i32, i32) {
    %c0_i32 = arith.constant 0 : i32
    %c0_i32_0 = arith.constant 0 : i32
    %c0_i32_1 = arith.constant 0 : i32
    return %c0_i32, %c0_i32_0 : i32, i32
  }
  func.func @transform_2(%arg0: i32) -> (i32, i32) {
    %c0_i32 = arith.constant 0 : i32
    %c0_i32_0 = arith.constant 0 : i32
    %c0_i32_1 = arith.constant 0 : i32
    return %c0_i32, %c0_i32_0 : i32, i32
  }
  func.func @transform_3(%arg0: i32) -> (i32, i32) {
    %c0_i32 = arith.constant 0 : i32
    %c0_i32_0 = arith.constant 0 : i32
    %c0_i32_1 = arith.constant 0 : i32
    return %c0_i32, %c0_i32_0 : i32, i32
  }
  func.func @transform_4(%arg0: i32) -> (i32, i32) {
    %c0_i32 = arith.constant 0 : i32
    %c0_i32_0 = arith.constant 0 : i32
    %c0_i32_1 = arith.constant 0 : i32
    return %c0_i32, %c0_i32_0 : i32, i32
  }
  func.func @transform_5(%arg0: i32) -> (i32, i32) {
    %c0_i32 = arith.constant 0 : i32
    %c0_i32_0 = arith.constant 0 : i32
    %c0_i32_1 = arith.constant 0 : i32
    return %c0_i32, %c0_i32_0 : i32, i32
  }
  func.func @transform_6(%arg0: i32) -> (i32, i32) {
    %c0_i32 = arith.constant 0 : i32
    %c0_i32_0 = arith.constant 0 : i32
    %c0_i32_1 = arith.constant 0 : i32
    return %c0_i32, %c0_i32_0 : i32, i32
  }
  func.func @transform_7(%arg0: i32) -> (i32, i32) {
    %c0_i32 = arith.constant 0 : i32
    %c0_i32_0 = arith.constant 0 : i32
    return %arg0, %c0_i32 : i32, i32
  }
}

</mosaic_0001>

<bundles_post_ra>
// kernel: tpu_custom_call.1
= control target key start
LH: loop header
LB: loop body
LE: loop exit
PB: predicated region body
PF: predicated region fallthrough
CT: control target
= control target key end

     0   :  { %12 = vsyncpa [#allocation3], 0  ;;  %s1081_s0 = inlined_call_operand.vmem [shape: f32[8,1], index: 0, kind: input, shape index: {}]   ;;  %s1082_s1 = inlined_call_operand.vmem [shape: f32[1,128], index: 1, kind: input, shape index: {}]   ;;  %s1083_s2 = inlined_call_operand.hbm [shape: bf16[128,128], index: 2, kind: input, shape index: {}]   ;;  %s1084_s3 = inlined_call_operand.hbm [shape: bf16[128,128], index: 3, kind: input, shape index: {}]   ;;  %s1085_s4 = inlined_call_operand.vmem [shape: f32[1,128], index: 4, kind: input, shape index: {}]   ;;  %s1086_s5 = inlined_call_operand.hbm [shape: bf16[128,128], index: 5, kind: input, shape index: {}]   ;;  %s1087_s6 = inlined_call_operand.vmem [shape: f32[1,128], index: 6, kind: input, shape index: {}]   ;;  %s1088_s7 = inlined_call_operand.hbm [shape: f32[8,128], index: 7, kind: output, shape index: {}]  }
   0x1   :  { %13 = vsyncpa [#allocation6], 0 }
   0x2   :  { %14 = vsyncpa [#allocation4], 0  ;;  %s899_s24 = smov [#allocation5]   ;;  %s900_s26 = smov [#allocation2]  }
   0x3   :  { %s36_s25 = sshll.u32 %s899_s24, 4  ;;  %s24_s27 = sshll.u32 %s900_s26, 4  ;;  %s37_s25 = int_to_ptr.vmem [resolvable:$true] %s36_s25  ;;  %s954_s27 = int_to_ptr.vmem [resolvable:$true] %s24_s27 }
   0x4   :  { %s805_s30 = scalar_lea.hbm %s1084_s3, 1024 }
   0x5   :  { %p806_p0 = scmp.ne.s32.totalorder %s1084_s3, %s805_s30  ;;  %p809_p1 = scmp.lt.u32.totalorder %s805_s30, %s1084_s3 }
   0x7   :  { %p811_p2 = pnand %p809_p1, %p806_p0 }
   0x9   :  { %814 = shalt.err (!%p811_p2)
}
   0xa   :  { %s815_s12 = scalar_lea.vmem %s37_s25, 1024  ;;  %p820_p4 = scmp.lt.s32.totalorder %s37_s25, %s37_s25 }
   0xb   :  { %p816_p3 = scmp.ne.s32.totalorder %s37_s25, %s815_s12  ;;  %p821_p5 = scmp.lt.s32.totalorder %s815_s12, %s815_s12 }
   0xd   :  { %p822_p6 = por %p821_p5, %p820_p4 }
   0xf   :  { %p823_p7 = pnand %p822_p6, %p816_p3 }
  0x11   :  { %826 = shalt.err (!%p823_p7)
}
  0x12   :  { %s901_s13 = smov 64   ;;  %s902_s14 = smov 4  }
  0x13   :  { %42 = dma.hbm_to_vmem [thread:$0]  %s1084_s3, 1024, %s37_s25, [#allocation6], %s901_s13, %s901_s13, %s902_s14  }
  0x14   :  { %s827_s19 = scalar_lea.hbm %s1083_s2, 1024 }
  0x15   :  { %p828_p8 = scmp.ne.s32.totalorder %s1083_s2, %s827_s19  ;;  %p831_p9 = scmp.lt.u32.totalorder %s827_s19, %s1083_s2 }
  0x17   :  { %p833_p10 = pnand %p831_p9, %p828_p8 }
  0x19   :  { %836 = shalt.err (!%p833_p10)
}
  0x1a   :  { %s837_s24 = scalar_lea.vmem %s954_s27, 1024  ;;  %p842_p12 = scmp.lt.s32.totalorder %s954_s27, %s954_s27 }
  0x1b   :  { %p838_p11 = scmp.ne.s32.totalorder %s954_s27, %s837_s24  ;;  %p843_p13 = scmp.lt.s32.totalorder %s837_s24, %s837_s24 }
  0x1d   :  { %p844_p0 = por %p843_p13, %p842_p12 }
  0x1f   :  { %p845_p1 = pnand %p844_p0, %p838_p11 }
  0x21   :  { %848 = shalt.err (!%p845_p1)
}
  0x22   :  { %30 = dma.hbm_to_vmem [thread:$0]  %s1083_s2, 1024, %s954_s27, [#allocation3], %s901_s13, %s901_s13, %s902_s14  }
  0x23   :  { %s903_s26 = smov [#allocation7]   ;;  %s849_s8 = scalar_lea.hbm %s1086_s5, 1024 }
  0x24   :  { %s50_s28 = sshll.u32 %s903_s26, 4  ;;  %p850_p2 = scmp.ne.s32.totalorder %s1086_s5, %s849_s8  ;;  %s51_s28 = int_to_ptr.vmem [resolvable:$true] %s50_s28 }
  0x25   :  { %p853_p3 = scmp.lt.u32.totalorder %s849_s8, %s1086_s5 }
  0x27   :  { %p855_p4 = pnand %p853_p3, %p850_p2 }
  0x29   :  { %858 = shalt.err (!%p855_p4)
}
  0x2a   :  { %s859_s15 = scalar_lea.vmem %s51_s28, 1024  ;;  %p864_p6 = scmp.lt.s32.totalorder %s51_s28, %s51_s28 }
  0x2b   :  { %p860_p5 = scmp.ne.s32.totalorder %s51_s28, %s859_s15  ;;  %p865_p7 = scmp.lt.s32.totalorder %s859_s15, %s859_s15 }
  0x2d   :  { %p866_p8 = por %p865_p7, %p864_p6 }
  0x2f   :  { %p867_p9 = pnand %p866_p8, %p860_p5 }
  0x31   :  { %870 = shalt.err (!%p867_p9)
}
  0x32   :  { %56 = dma.hbm_to_vmem [thread:$0]  %s1086_s5, 1024, %s51_s28, [#allocation6], %s901_s13, %s901_s13, %s902_s14  }
  0x33   :  { %893 = dma.done.wait [#allocation3], 1024  }
  0x34   :  { %894 = vsyncadd [#allocation3], 4294966272 }
  0x35   :  { %895 = dma.done.wait [#allocation6], 2048  }
  0x36   :  { %896 = vsyncadd [#allocation6], 4294965248  ;;  %v904_v0 = vmov 0   ;;  %v69_v1 = vld [vmem:[%s1081_s0] sm:$0xff]  ;;  %v905_v4 = vmov 0.0   ;;  %v775_v5 = vld [vmem:[#allocation5 + $0x8] sm:$0xff]  }
  0x37   :  { %772 = vset.pattern.permute.xlu0 %v904_v0  ;;  %v773_v2 = vld [vmem:[#allocation5] sm:$0xff]   ;;  %696 = vmatprep.subr.bf16.mxu0 %v905_v4  ;;  %v776_v6 = vld [vmem:[#allocation2 + $0x8] sm:$0xff]   ;;  %v777_v7 = vld [vmem:[#allocation5 + $0x10] sm:$0xff]   ;;  %vm906_vm0 = vmmov 0   ;;  %v907_v32 = vmov 683565275  }
  0x38   :  { %73 = vperm.xlu0 %772, %v69_v1   ;;  %v774_v3 = vld [vmem:[#allocation2] sm:$0xff]   ;;  %715 = vmatprep.subr.bf16.mxu1 %v905_v4  ;;  %v778_v8 = vld [vmem:[#allocation2 + $0x10] sm:$0xff]   ;;  %v779_v9 = vld [vmem:[#allocation5 + $0x18] sm:$0xff]   ;;  %v908_v34 = vmov 2475754826   ;;  %s913_s19 = smov [#allocation8]  }
  0x39   :  { %697 = vmatpush3.bf16.msra.mxu0 %v773_v2  ;;  %716 = vmatpush3.bf16.msra.mxu1 %v774_v3  ;;  %v780_v10 = vld [vmem:[#allocation2 + $0x18] sm:$0xff]   ;;  %v781_v11 = vld [vmem:[#allocation5 + $0x20] sm:$0xff]   ;;  %v783_v13 = vld [vmem:[#allocation5 + $0x28] sm:$0xff]   ;;  %v909_v37 = vmov 2131351028   ;;  %s624_s20 = sshll.u32 %s913_s19, 4  ;;  %s625_s20 = int_to_ptr.vmem [resolvable:$true] %s624_s20 }
  0x3a   :  { %698 = vmatprep.subr.bf16.mxu0 %v905_v4  ;;  %717 = vmatprep.subr.bf16.mxu1 %v905_v4  ;;  %v782_v12 = vld [vmem:[#allocation2 + $0x20] sm:$0xff]   ;;  %v784_v14 = vld [vmem:[#allocation2 + $0x28] sm:$0xff]   ;;  %v785_v15 = vld [vmem:[#allocation5 + $0x30] sm:$0xff]   ;;  %v910_v40 = vmov 2102212464   ;;  %p876_p11 = scmp.lt.s32.totalorder %s625_s20, %s625_s20 }
  0x3b   :  { %712 = vmatprep.mubr.msk.f32.mxu0 %vm906_vm0, %v905_v4  ;;  %731 = vmatprep.mubr.msk.f32.mxu1 %vm906_vm0, %v905_v4  ;;  %v786_v16 = vld [vmem:[#allocation2 + $0x30] sm:$0xff]   ;;  %v787_v17 = vld [vmem:[#allocation5 + $0x38] sm:$0xff]   ;;  %v634_v19 = vld [vmem:[%s1082_s1] ss:$0 sm:$0xff]  ;;  %v911_v43 = vmov 920167782  }
  0x3c   :  { %v788_v18 = vld [vmem:[#allocation2 + $0x38] sm:$0xff]   ;;  %v912_v46 = vmov 1326507024  }
  0x3d   :  { %699 = vmatpush3.bf16.msra.mxu0 %v775_v5  ;;  %718 = vmatpush3.bf16.msra.mxu1 %v776_v6 }
  0x3e   :  { %700 = vmatprep.subr.bf16.mxu0 %v905_v4  ;;  %719 = vmatprep.subr.bf16.mxu1 %v905_v4 }
  0x41   :  { %701 = vmatpush3.bf16.msra.mxu0 %v777_v7  ;;  %720 = vmatpush3.bf16.msra.mxu1 %v778_v8 }
  0x42   :  { %702 = vmatprep.subr.bf16.mxu0 %v905_v4  ;;  %721 = vmatprep.subr.bf16.mxu1 %v905_v4 }
  0x45   :  { %703 = vmatpush3.bf16.msra.mxu0 %v779_v9  ;;  %722 = vmatpush3.bf16.msra.mxu1 %v780_v10 }
  0x46   :  { %704 = vmatprep.subr.bf16.mxu0 %v905_v4  ;;  %723 = vmatprep.subr.bf16.mxu1 %v905_v4 }
  0x49   :  { %705 = vmatpush3.bf16.msra.mxu0 %v781_v11  ;;  %724 = vmatpush3.bf16.msra.mxu1 %v782_v12 }
  0x4a   :  { %706 = vmatprep.subr.bf16.mxu0 %v905_v4  ;;  %725 = vmatprep.subr.bf16.mxu1 %v905_v4 }
  0x4d   :  { %707 = vmatpush3.bf16.msra.mxu0 %v783_v13  ;;  %726 = vmatpush3.bf16.msra.mxu1 %v784_v14 }
  0x4e   :  { %708 = vmatprep.subr.bf16.mxu0 %v905_v4  ;;  %727 = vmatprep.subr.bf16.mxu1 %v905_v4 }
  0x51   :  { %709 = vmatpush3.bf16.msra.mxu0 %v785_v15  ;;  %728 = vmatpush3.bf16.msra.mxu1 %v786_v16 }
  0x52   :  { %710 = vmatprep.subr.bf16.mxu0 %v905_v4  ;;  %729 = vmatprep.subr.bf16.mxu1 %v905_v4 }
  0x55   :  { %711 = vmatpush3.bf16.msra.mxu0 %v787_v17  ;;  %730 = vmatpush3.bf16.msra.mxu1 %v788_v18 }
  0x56   :  { %734 = vmatprep.subr.bf16.mxu0 %v905_v4 }
  0xb7   :  { %v74_v20 = vpop.permute.xlu0 %73 }
  0xb8   :  { %v1033_v21 = vmul.f32 %v634_v19, %v74_v20 }
  0xba   :  { %v86_v22 = vand.u32 2139095040, %v1033_v21  ;;  %v83_v26 = vand.u32 2147483647, %v1033_v21  ;;  %vm85_vm8 = vcmp.lt.s32.totalorder %v1033_v21, 0 }
  0xbc   :  { %v87_v23 = vshrl.u32 %v86_v22, 23  ;;  %v90_v29 = vand.u32 8388607, %v83_v26  ;;  %vm84_vm9 = vcmp.le.f32.partialorder %v83_v26, 0.7853982 }
  0xbe   :  { %v635_v24 = vadd.s32 4294967169, %v87_v23  ;;  %v91_v48 = vor.u32 8388608, %v90_v29 }
  0xc0   :  { %v93_v25 = vadd.s32 1, %v635_v24  ;;  %v131_v62 = vshll.u32 %v91_v48, 8 }
  0xc2   :  { %vm94_vm1 = vcmp.gt.s32.totalorder %v93_v25, 0 }
  0xc3   :  { %v95_v27 = vsel %vm94_vm1, %v93_v25, 0  ;;  %vm175_vm1 = vweird.f32 %v1033_v21 }
  0xc4   :  { %v97_v28 = vand.u32 31, %v95_v27  ;;  %v96_v31 = vshrl.u32 %v95_v27, 5 }
  0xc6   :  { %v98_v30 = vsub.s32 32, %v97_v28  ;;  %v100_v33 = vshll.u32 %v907_v32, %v97_v28  ;;  %v103_v35 = vshll.u32 %v908_v34, %v97_v28  ;;  %v106_v39 = vshll.u32 %v909_v37, %v97_v28 }
  0xc7   :  { %v109_v42 = vshll.u32 %v910_v40, %v97_v28  ;;  %v112_v45 = vshll.u32 %v911_v43, %v97_v28  ;;  %vm115_vm2 = vcmp.lt.s32.totalorder %v96_v31, 1  ;;  %vm118_vm3 = vcmp.lt.s32.totalorder %v96_v31, 4 }
  0xc8   :  { %v101_v36 = vshrl.u32 %v908_v34, %v98_v30  ;;  %v104_v38 = vshrl.u32 %v909_v37, %v98_v30  ;;  %v107_v41 = vshrl.u32 %v910_v40, %v98_v30  ;;  %v110_v44 = vshrl.u32 %v911_v43, %v98_v30 }
  0xc9   :  { %v113_v47 = vshrl.u32 %v912_v46, %v98_v30  ;;  %v99_v57 = vshrl.u32 %v907_v32, %v98_v30  ;;  %vm117_vm4 = vcmp.lt.s32.totalorder %v96_v31, 3  ;;  %vm116_vm5 = vcmp.lt.s32.totalorder %v96_v31, 2 }
  0xca   :  { %v102_v49 = vor.u32 %v101_v36, %v100_v33  ;;  %v105_v50 = vor.u32 %v104_v38, %v103_v35  ;;  %v108_v51 = vor.u32 %v107_v41, %v106_v39  ;;  %v111_v52 = vor.u32 %v110_v44, %v109_v42 }
  0xcb   :  { %v114_v53 = vor.u32 %v113_v47, %v112_v45 }
  0xcc   :  { %v120_v54 = vsel %vm118_vm3, %v108_v51, 2102212464  ;;  %v123_v55 = vsel %vm115_vm2, %v102_v49, %v105_v50  ;;  %v127_v56 = vsel %vm115_vm2, %v105_v50, %v108_v51  ;;  %v124_v58 = vsel %vm118_vm3, %v111_v52, 920167782 }
  0xcd   :  { %v128_v59 = vsel %vm118_vm3, %v114_v53, 1326507024  ;;  %v125_v60 = vsel %vm117_vm4, %v108_v51, %v124_v58  ;;  %v119_v63 = vsel %vm115_vm2, %v99_v57, %v102_v49  ;;  %v121_v0 = vsel %vm117_vm4, %v105_v50, %v120_v54  ;;  %v790_v57 = vld [vmem:[#allocation7 + $0x8] sm:$0xff]   ;;  %v791_v58 = vld [vmem:[#allocation7 + $0x10] sm:$0xff]  }
  0xce   :  { %v129_v61 = vsel %vm117_vm4, %v111_v52, %v128_v59  ;;  %v126_v1 = vsel %vm116_vm5, %v123_v55, %v125_v60  ;;  %v122_v8 = vsel %vm116_vm5, %v119_v63, %v121_v0  ;;  %v793_v59 = vld [vmem:[#allocation7 + $0x20] sm:$0xff]   ;;  %v794_v60 = vld [vmem:[#allocation7 + $0x28] sm:$0xff]  }
  0xcf   :  { %v130_v2 = vsel %vm116_vm5, %v127_v56, %v129_v61  ;;  %v1042_v6 = vmul.u32.u64.low %v131_v62, %v126_v1  ;;  %v1043_v7 = vmul.u32.u64.high %v131_v62, %v126_v1, %v1042_v6  ;;  %v138_v10 = vmul.u32 %v131_v62, %v122_v8  ;;  %v789_v56 = vld [vmem:[#allocation7] sm:$0xff]   ;;  %v795_v61 = vld [vmem:[#allocation7 + $0x30] sm:$0xff]  }
  0xd0   :  { %v1039_v3 = vmul.u32.u64.low %v131_v62, %v130_v2  ;;  %v1040_v5 = vmul.u32.u64.high %v131_v62, %v130_v2, %v1039_v3  ;;  %v796_v62 = vld [vmem:[#allocation7 + $0x38] sm:$0xff]   ;;  %v659_v1 = vld [vmem:[%s1085_s4] ss:$0 sm:$0xff]  ;;  %s871_s4 = scalar_lea.vmem %s625_s20, 128 }
  0xd1   :  { %v141_v9 = vadd.s32 1, %v1043_v7  ;;  %p872_p10 = scmp.ne.s32.totalorder %s625_s20, %s871_s4  ;;  %p877_p12 = scmp.lt.s32.totalorder %s871_s4, %s871_s4 }
  0xd2   :  { %vm140_vm6 = vc.u32 %v1040_v5, %v1042_v6  ;;  %v139_v23 = vadd.s32 %v1042_v6, %v1040_v5 }
  0xd3   :  { %v142_v11 = vsel %vm140_vm6, %v141_v9, %v1043_v7  ;;  %p878_p13 = por %p877_p12, %p876_p11 }
  0xd4   :  { %v143_v12 = vadd.s32 %v142_v11, %v138_v10 }
  0xd5   :  { %p879_p0 = pnand %p878_p13, %p872_p10 }
  0xd6   :  { %v144_v13 = vadd.s32 536870912, %v143_v12 }
  0xd8   :  { %v145_v14 = vshrl.u32 %v144_v13, 30 }
  0xda   :  { %v146_v15 = vshll.u32 %v145_v14, 30  ;;  %v169_v36 = vsub.s32 4, %v145_v14 }
  0xdc   :  { %v147_v16 = vsub.s32 %v143_v12, %v146_v15  ;;  %v170_v39 = vsel %vm85_vm8, %v169_v36, %v145_v14  ;;  %v660_v12 = vld [vmem:[%s1087_s6] ss:$0 sm:$0xff] }
  0xdd   :  { %v172_v41 = vsel %vm84_vm9, 0, %v170_v39 }
  0xde   :  { %v149_v17 = vsub.s32 0, %v147_v16  ;;  %v176_v42 = vadd.s32 3, %v172_v41  ;;  %v296_v43 = vand.u32 3, %v172_v41 }
  0xe0   :  { %v636_v18 = vmin.u32 %v149_v17, %v147_v16  ;;  %v177_v44 = vand.u32 3, %v176_v42  ;;  %vm301_vm10 = vcmp.eq.s32.totalorder %v296_v43, 2  ;;  %vm298_vm12 = vcmp.eq.s32.totalorder %v296_v43, 0 }
  0xe1   :  { %vm297_vm14 = vcmp.lt.s32.totalorder %v296_v43, 2 }
  0xe2   :  { %v151_v19 = vclz %v636_v18  ;;  %vm182_vm11 = vcmp.eq.s32.totalorder %v177_v44, 2  ;;  %vm179_vm13 = vcmp.eq.s32.totalorder %v177_v44, 0  ;;  %vm178_vm15 = vcmp.lt.s32.totalorder %v177_v44, 2 }
  0xe4   :  { %v637_v20 = vadd.s32 4294967294, %v151_v19 }
  0xe6   :  { %vm638_vm7 = vcmp.lt.s32.totalorder %v637_v20, 0 }
  0xe7   :  { %v154_v22 = vsel %vm638_vm7, 0, %v637_v20 }
  0xe8   :  { %v155_v24 = vsub.s32 32, %v154_v22  ;;  %v159_v25 = vsub.s32 4294967266, %v154_v22  ;;  %v156_v27 = vshll.u32 %v147_v16, %v154_v22 }
  0xea   :  { %v157_v28 = vshrl.u32 %v139_v23, %v155_v24  ;;  %v160_v29 = vadd.s32 127, %v159_v25 }
  0xec   :  { %v158_v30 = vor.u32 %v157_v28, %v156_v27  ;;  %v161_v31 = vshll.u32 %v160_v29, 23 }
  0xee   :  { %v162_v32 = vor.u32 4788187, %v161_v31  ;;  %v165_v34 = vcvt.s32.f32 %v158_v30 }
  0xf0   :  { %v163_v33 = vand.u32 2147483647, %v162_v32 }
  0xf2   :  { %v166_v35 = vmul.f32 %v165_v34, %v163_v33 }
  0xf4   :  { %v167_v37 = vxor.u32 2147483648, %v166_v35 }
  0xf6   :  { %v168_v38 = vsel %vm85_vm8, %v167_v37, %v166_v35 }
  0xf7   :  { %v171_v40 = vsel %vm84_vm9, %v1033_v21, %v168_v38  ;;  %v792_v21 = vld [vmem:[#allocation7 + $0x18] sm:$0xff]  }
  0xf8   :  { %797 = vcosq.f32 %v171_v40 }
  0xf9   :  { %799 = vsinq.f32 %v171_v40 }
 0x102   :  { %v798_v45 = vpop.eup %797 }
 0x103   :  { %v800_v46 = vpop.eup %799  ;;  %v183_v47 = vxor.u32 2147483648, %v798_v45 }
 0x104   :  { %v180_v48 = vxor.u32 2147483648, %v800_v46 }
 0x105   :  { %v303_v49 = vsel %vm301_vm10, %v183_v47, %v800_v46  ;;  %v184_v50 = vsel %vm182_vm11, %v183_v47, %v800_v46 }
 0x106   :  { %v300_v26 = vsel %vm298_vm12, %v798_v45, %v180_v48  ;;  %v181_v51 = vsel %vm179_vm13, %v798_v45, %v180_v48 }
 0x107   :  { %v304_v52 = vsel %vm297_vm14, %v300_v26, %v303_v49  ;;  %v185_v53 = vsel %vm178_vm15, %v181_v51, %v184_v50 }
 0x108   :  { %v305_v54 = vsel %vm175_vm1, nan, %v304_v52  ;;  %v186_v55 = vsel %vm175_vm1, nan, %v185_v53 }
 0x109   :  { %713 = vmatmul.mubr.f32.vlgmr.msra.gmra.mrb[0].mxu0 %v305_v54  ;;  %732 = vmatmul.mubr.f32.vlgmr.msra.gmra.mrb[0].mxu1 %v186_v55 }
 0x10a   :  { %750 = vmatprep.mubr.msk.f32.mxu0 %vm906_vm0, %v905_v4  ;;  %735 = vmatpush3.bf16.msra.mxu0 %v789_v56 }
 0x10b   :  { %736 = vmatprep.subr.bf16.mxu0 %v905_v4 }
 0x10e   :  { %737 = vmatpush3.bf16.msra.mxu0 %v790_v57 }
 0x10f   :  { %738 = vmatprep.subr.bf16.mxu0 %v905_v4 }
 0x112   :  { %739 = vmatpush3.bf16.msra.mxu0 %v791_v58 }
 0x113   :  { %740 = vmatprep.subr.bf16.mxu0 %v905_v4 }
 0x116   :  { %741 = vmatpush3.bf16.msra.mxu0 %v792_v21 }
 0x117   :  { %742 = vmatprep.subr.bf16.mxu0 %v905_v4 }
 0x11a   :  { %743 = vmatpush3.bf16.msra.mxu0 %v793_v59 }
 0x11b   :  { %744 = vmatprep.subr.bf16.mxu0 %v905_v4 }
 0x11e   :  { %745 = vmatpush3.bf16.msra.mxu0 %v794_v60 }
 0x11f   :  { %746 = vmatprep.subr.bf16.mxu0 %v905_v4 }
 0x122   :  { %747 = vmatpush3.bf16.msra.mxu0 %v795_v61 }
 0x123   :  { %748 = vmatprep.subr.bf16.mxu0 %v905_v4 }
 0x126   :  { %749 = vmatpush3.bf16.msra.mxu0 %v796_v62 }
 0x1dc   :  { %v404_v63 = vpop.f32.mrb[0].mxu0  ;;  %v490_v0 = vpop.f32.mrb[0].mxu1 }
 0x1dd   :  { %v491_v2 = vadd.f32 %v490_v0, %v404_v63  ;;  %v714_v3 = vpop.f32.mrb[1].mxu0  ;;  %v733_v5 = vpop.f32.mrb[1].mxu1 }
 0x1df   :  { %v501_v6 = vadd.f32 %v659_v1, %v491_v2 }
 0x1e1   :  { %v502_v7 = vsub.f32 0.0, %v501_v6 }
 0x1e3   :  { %v503_v8 = vmul.f32 1.442695, %v502_v7 }
 0x1e5   :  { %801 = vpow2.f32 %v503_v8 }
 0x1ef   :  { %v802_v9 = vpop.eup %801 }
 0x1f0   :  { %v505_v10 = vadd.f32 1.0, %v802_v9 }
 0x1f2   :  { %803 = vrcp.f32 %v505_v10 }
 0x1fc   :  { %v804_v11 = vpop.eup %803 }
 0x1fd   :  { %v507_v4 = vmul.f32 %v804_v11, %v501_v6 }
 0x1ff   :  { %751 = vmatmul.mubr.f32.vlgmr.msra.gmra.mrb[2].mxu0 %v507_v4 }
 0x2d2   :  { %v613_v13 = vpop.f32.mrb[2].mxu0 }
 0x2d3   :  { %v614_v14 = vadd.f32 %v660_v12, %v613_v13  ;;  %v752_v15 = vpop.f32.mrb[3].mxu0 }
 0x2d5   :  { %617 = vst [vmem:[#allocation8] sm:$0xff] %v614_v14 }
 0x2d6   :  { %882 = shalt.err (!%p879_p0)
}
 0x2d7   :  { %s883_s23 = scalar_lea.hbm %s1088_s7, 128 }
 0x2d8   :  { %p884_p1 = scmp.ne.s32.totalorder %s1088_s7, %s883_s23  ;;  %p887_p2 = scmp.lt.u32.totalorder %s883_s23, %s1088_s7 }
 0x2da   :  { %p889_p3 = pnand %p887_p2, %p884_p1 }
 0x2dc   :  { %892 = shalt.err (!%p889_p3)
}
 0x2dd   :  { %627 = dma.vmem_to_hbm [thread:$0]  %s625_s20, 128, %s1088_s7, [#allocation4]  }
 0x2de   :  { %897 = dma.done.wait [#allocation4], 128  }
 0x2df   :  { %898 = vsyncadd [#allocation4], 4294967168 }
 0x2e0   :  { %631 = vsyncpa [#allocation3], 1 }
 0x2e1   :  { %632 = vsyncpa [#allocation6], 1 }
 0x2e2   :  { %633 = vsyncpa [#allocation4], 1 }

</bundles_post_ra>
